<compile_context>
chip_gen: v7x
topology: tpu7x:2x2x1
jax: 0.10.0
libtpu: 0.0.40
codegen_flags: <defaults>
</compile_context>

<pallas_src>
import math
import jax
import jax.numpy as jnp
from jax import lax
from jax.experimental import pallas as pl
from jax.experimental.pallas import tpu as pltpu


def _gelu_exact(v):
    # exact (erf-based) GELU, matching torch.nn.GELU() default
    return 0.5 * v * (1.0 + lax.erf(v * (1.0 / math.sqrt(2.0))))


def _gelu_tanh(v):
    # tanh approximation: routes the transcendental to the (otherwise idle) EUP.
    c = math.sqrt(2.0 / math.pi)
    return 0.5 * v * (1.0 + jnp.tanh(c * (v + 0.044715 * (v * v * v))))


def make_align_kernel(Num, Embed, C, H, W, base, pad_w):
    HW = H * W

    def kernel(x_ref, wl_ref, bl_ref, k_ref, shift_ref, o_ref, pad_ref):
        # ---- spatial_align: Linear(Num -> H*W) + GELU (one batch per step) ----
        z = jnp.dot(x_ref[0], wl_ref[...], preferred_element_type=jnp.float32)
        z = _gelu_tanh(z + bl_ref[...])                        # (Embed, HW) f32

        # ---- stash activations in lane-padded scratch; zero-fill the halos ----
        # The halos cover every out-of-image ROW read of the 3x3 taps, so only
        # the width-wraparound (kw) masks remain below.  All three stores are
        # lane-aligned (base, HW, pad_w are multiples of 128).
        pad_ref[:, :base] = jnp.zeros((Embed, base), jnp.float32)
        pad_ref[:, base + HW:] = jnp.zeros((Embed, pad_w - base - HW), jnp.float32)
        pad_ref[:, base:base + HW] = z

        # ---- width-boundary masks over the flattened hw axis -------------------
        hw = lax.broadcasted_iota(jnp.int32, (1, HW), 1)
        if W & (W - 1) == 0:                                   # W power of two
            ww = hw & (W - 1)
        else:
            ww = hw % W
        left_ok = ww >= 1          # kw == 0 taps would read previous row's last col
        right_ok = ww <= W - 2     # kw == 2 taps would read next row's first col

        # ---- channel_align: 3x3 conv (BN scale pre-folded into weights) -------
        # Per-tap accumulating matmul straight from the window load: no im2col
        # slab, no concatenate.
        acc = jnp.zeros((C, HW), jnp.float32)
        for kh in range(3):
            for kw in range(3):
                t = kh * 3 + kw
                off = (kh - 1) * W + (kw - 1)
                win = pad_ref[:, base + off:base + off + HW]   # (Embed, HW)
                if kw == 0:
                    win = jnp.where(left_ok, win, jnp.zeros_like(win))
                elif kw == 2:
                    win = jnp.where(right_ok, win, jnp.zeros_like(win))
                acc = acc + jnp.dot(k_ref[t], win,
                                    preferred_element_type=jnp.float32)

        # folded conv-bias + BatchNorm(eval) shift, then exact GELU (tiny tile).
        y = acc + shift_ref[...]
        o_ref[0] = _gelu_exact(y).astype(o_ref.dtype)

    return kernel


def alignment_forward(x, params, C, H, W):
    B, Num, Embed = x.shape
    HW = H * W
    base = 128                      # lane-aligned halo width (needs >= W + 1)
    assert W + 1 <= base, "halo must cover the furthest 3x3 tap offset"
    pad_w = base + HW + base        # halo | activations | halo, all 128-aligned

    # Lane-dense f32 parameter layouts (HW on the 128-lane axis everywhere).
    xt = jnp.transpose(x, (0, 2, 1)).astype(jnp.float32)               # (B, Embed, Num)
    wlt = params["w_lin"].T.astype(jnp.float32)                        # (Num, HW)
    bl = params["b_lin"].reshape(1, HW).astype(jnp.float32)

    # BatchNorm (eval) folded: scale goes into the conv weights, bias+mean+beta
    # collapse into a single per-channel shift.
    inv_std = 1.0 / jnp.sqrt(params["bn_var"] + params["bn_eps"])
    scale = params["bn_gamma"] * inv_std                                # (C,)
    shift = params["bn_beta"] + (params["b_conv"] - params["bn_mean"]) * scale
    # (C, Embed, 3, 3) * scale -> (kh, kw, C, Embed) -> (9, C, Embed)
    w_scaled = params["w_conv"] * scale.reshape(C, 1, 1, 1)
    k9 = jnp.transpose(w_scaled, (2, 3, 0, 1)).reshape(9, C, Embed).astype(jnp.float32)
    shift2 = shift.reshape(C, 1).astype(jnp.float32)

    kernel = make_align_kernel(Num, Embed, C, H, W, base, pad_w)
    out = pl.pallas_call(
        kernel,
        out_shape=jax.ShapeDtypeStruct((B, C, HW), jnp.float32),
        grid_spec=pltpu.PrefetchScalarGridSpec(
            num_scalar_prefetch=0,
            grid=(B,),                                  # one batch per grid step
            in_specs=[
                pl.BlockSpec((1, Embed, Num), lambda b: (b, 0, 0)),
                pl.BlockSpec((Num, HW), lambda b: (0, 0)),       # weights stay resident
                pl.BlockSpec((1, HW), lambda b: (0, 0)),
                pl.BlockSpec((9, C, Embed), lambda b: (0, 0, 0)),
                pl.BlockSpec((C, 1), lambda b: (0, 0)),
            ],
            out_specs=pl.BlockSpec((1, C, HW), lambda b: (b, 0, 0)),
            scratch_shapes=[pltpu.VMEM((Embed, pad_w), jnp.float32)],
        ),
        compiler_params=pltpu.CompilerParams(dimension_semantics=("parallel",)),
    )(xt, wlt, bl, k9, shift2)

    # (B, C, HW) -> (B, C*H*W): identical ordering to PyTorch NCHW flatten(1).
    return out.reshape(B, C * HW)


def alignment_ref(x, params, C, H, W):
    """Pure-JAX reference mirroring the PyTorch forward (BN in eval mode)."""
    B, Num, Embed = x.shape
    HW = H * W
    xp = jnp.transpose(x, (0, 2, 1))                               # (B, Embed, Num)
    z = xp @ params["w_lin"].T + params["b_lin"]                   # (B, Embed, HW)
    z = jax.nn.gelu(z, approximate=False)
    z = z.reshape(B, Embed, H, W)
    y = lax.conv_general_dilated(
        z, params["w_conv"], window_strides=(1, 1), padding=((1, 1), (1, 1)),
        dimension_numbers=("NCHW", "OIHW", "NCHW"))
    y = y + params["b_conv"].reshape(1, C, 1, 1)
    inv_std = 1.0 / jnp.sqrt(params["bn_var"] + params["bn_eps"])
    g = (params["bn_gamma"] * inv_std).reshape(1, C, 1, 1)
    y = (y - params["bn_mean"].reshape(1, C, 1, 1)) * g + params["bn_beta"].reshape(1, C, 1, 1)
    y = jax.nn.gelu(y, approximate=False)
    return y.reshape(B, -1)


if __name__ == "__main__":
    key = jax.random.PRNGKey(0)
    B, Num, Embed = 2, 8, 32       # feat_s : (B, Num, Embed)
    C, H, W = 4, 16, 16            # feat_t : (B, C, H, W)  (only shapes are used)
    ks = jax.random.split(key, 10)

    x = jax.random.normal(ks[0], (B, Num, Embed), jnp.float32)
    feat_t = jax.random.normal(ks[1], (B, C, H, W), jnp.float32)

    params = dict(
        w_lin=0.1 * jax.random.normal(ks[2], (H * W, Num), jnp.float32),
        b_lin=0.05 * jax.random.normal(ks[3], (H * W,), jnp.float32),
        w_conv=0.1 * jax.random.normal(ks[4], (C, Embed, 3, 3), jnp.float32),
        b_conv=0.05 * jax.random.normal(ks[5], (C,), jnp.float32),
        bn_gamma=1.0 + 0.1 * jax.random.normal(ks[6], (C,), jnp.float32),
        bn_beta=0.05 * jax.random.normal(ks[7], (C,), jnp.float32),
        bn_mean=0.1 * jax.random.normal(ks[8], (C,), jnp.float32),
        bn_var=1.0 + 0.1 * jnp.abs(jax.random.normal(ks[9], (C,), jnp.float32)),
        bn_eps=1e-5,
    )

    out = jax.block_until_ready(alignment_forward(x, params, C, H, W))
    ref = jax.block_until_ready(alignment_ref(x, params, C, H, W))

    assert out.shape == (B, C * H * W), out.shape
    err = float(jnp.max(jnp.abs(out - ref)))
    if err > 5e-2:
        raise AssertionError(f"kernel/reference mismatch, max abs err = {err}")
    print("KERNEL_OK")
</pallas_src>

<mosaic_0001>
module attributes {stable_mosaic.version = 11 : i64} {
  func.func @kernel(%arg0: i32, %arg1: memref<1x32x8xf32, #tpu.memory_space<vmem>>, %arg2: memref<8x256xf32, #tpu.memory_space<vmem>>, %arg3: memref<1x256xf32, #tpu.memory_space<vmem>>, %arg4: memref<9x4x32xf32, #tpu.memory_space<vmem>>, %arg5: memref<4x1xf32, #tpu.memory_space<vmem>>, %arg6: memref<1x4x256xf32, #tpu.memory_space<vmem>>, %arg7: memref<32x512xf32, #tpu.memory_space<vmem>>) attributes {dimension_semantics = [#tpu.dimension_semantics<parallel>], iteration_bounds = array<i64: 2>, scalar_prefetch = 0 : i64, scratch_operands = 1 : i64, tpu.core_type = #tpu.core_type<tc>, window_params = [{transform_indices = @transform_0, window_bounds = array<i64: 1, 32, 8>}, {pipeline_mode = #tpu.pipeline_mode<synchronous>, transform_indices = @transform_1, window_bounds = array<i64: 8, 256>}, {pipeline_mode = #tpu.pipeline_mode<synchronous>, transform_indices = @transform_2, window_bounds = array<i64: 1, 256>}, {pipeline_mode = #tpu.pipeline_mode<synchronous>, transform_indices = @transform_3, window_bounds = array<i64: 9, 4, 32>}, {pipeline_mode = #tpu.pipeline_mode<synchronous>, transform_indices = @transform_4, window_bounds = array<i64: 4, 1>}, {transform_indices = @transform_5, window_bounds = array<i64: 1, 4, 256>}]} {
    %c0 = arith.constant 0 : index
    %c0_0 = arith.constant 0 : index
    %c0_1 = arith.constant 0 : index
    %0 = vector.load %arg1[%c0, %c0_0, %c0_1] : memref<1x32x8xf32, #tpu.memory_space<vmem>>, vector<1x32x8xf32>
    %1 = vector.shape_cast %0 : vector<1x32x8xf32> to vector<32x8xf32>
    %c0_2 = arith.constant 0 : index
    %c0_3 = arith.constant 0 : index
    %2 = vector.load %arg2[%c0_2, %c0_3] : memref<8x256xf32, #tpu.memory_space<vmem>>, vector<8x256xf32>
    %cst = arith.constant dense<0.000000e+00> : vector<32x256xf32>
    %3 = tpu.matmul %1, %2, %cst {dimension_numbers = #tpu.dot_dimension_numbers<[1], [0], [0], [1], [0, 0, 1, 1], [], []>} : vector<32x8xf32>, vector<8x256xf32>, vector<32x256xf32> -> vector<32x256xf32>
    %c0_4 = arith.constant 0 : index
    %c0_5 = arith.constant 0 : index
    %4 = vector.load %arg3[%c0_4, %c0_5] : memref<1x256xf32, #tpu.memory_space<vmem>>, vector<1x256xf32>
    %5 = vector.broadcast %4 : vector<1x256xf32> to vector<32x256xf32>
    %6 = arith.addf %3, %5 : vector<32x256xf32>
    %cst_6 = arith.constant 5.000000e-01 : f32
    %7 = vector.broadcast %cst_6 : f32 to vector<32x256xf32>
    %8 = arith.mulf %7, %6 : vector<32x256xf32>
    %9 = arith.mulf %6, %6 : vector<32x256xf32>
    %10 = arith.mulf %9, %6 : vector<32x256xf32>
    %cst_7 = arith.constant 4.471500e-02 : f32
    %11 = vector.broadcast %cst_7 : f32 to vector<32x256xf32>
    %12 = arith.mulf %11, %10 : vector<32x256xf32>
    %13 = arith.addf %6, %12 : vector<32x256xf32>
    %cst_8 = arith.constant 0.797884583 : f32
    %14 = vector.broadcast %cst_8 : f32 to vector<32x256xf32>
    %15 = arith.mulf %14, %13 : vector<32x256xf32>
    %16 = math.tanh %15 : vector<32x256xf32>
    %cst_9 = arith.constant 1.000000e+00 : f32
    %17 = vector.broadcast %cst_9 : f32 to vector<32x256xf32>
    %18 = arith.addf %17, %16 : vector<32x256xf32>
    %19 = arith.mulf %8, %18 : vector<32x256xf32>
    %cst_10 = arith.constant 0.000000e+00 : f32
    %20 = vector.broadcast %cst_10 : f32 to vector<32x128xf32>
    %c0_11 = arith.constant 0 : index
    %c0_12 = arith.constant 0 : index
    %21 = vector.load %arg7[%c0_11, %c0_12] : memref<32x512xf32, #tpu.memory_space<vmem>>, vector<32x128xf32>
    tpu.vector_store %arg7[%c0_11, %c0_12], %20 {strides = array<i32>} : memref<32x512xf32, #tpu.memory_space<vmem>>, vector<32x128xf32>,
    %cst_13 = arith.constant 0.000000e+00 : f32
    %22 = vector.broadcast %cst_13 : f32 to vector<32x128xf32>
    %c0_14 = arith.constant 0 : index
    %c384 = arith.constant 384 : index
    %23 = vector.load %arg7[%c0_14, %c384] : memref<32x512xf32, #tpu.memory_space<vmem>>, vector<32x128xf32>
    tpu.vector_store %arg7[%c0_14, %c384], %22 {strides = array<i32>} : memref<32x512xf32, #tpu.memory_space<vmem>>, vector<32x128xf32>,
    %c0_15 = arith.constant 0 : index
    %c128 = arith.constant 128 : index
    %24 = vector.load %arg7[%c0_15, %c128] : memref<32x512xf32, #tpu.memory_space<vmem>>, vector<32x256xf32>
    tpu.vector_store %arg7[%c0_15, %c128], %19 {strides = array<i32>} : memref<32x512xf32, #tpu.memory_space<vmem>>, vector<32x256xf32>,
    %25 = tpu.iota {dimensions = array<i32: 1>} : vector<1x256xi32>
    %c15_i32 = arith.constant 15 : i32
    %26 = vector.broadcast %c15_i32 : i32 to vector<1x256xi32>
    %27 = arith.andi %25, %26 : vector<1x256xi32>
    %c1_i32 = arith.constant 1 : i32
    %28 = vector.broadcast %c1_i32 : i32 to vector<1x256xi32>
    %29 = arith.cmpi sge, %27, %28 : vector<1x256xi32>
    %c14_i32 = arith.constant 14 : i32
    %30 = vector.broadcast %c14_i32 : i32 to vector<1x256xi32>
    %31 = arith.cmpi sle, %27, %30 : vector<1x256xi32>
    %cst_16 = arith.constant 0.000000e+00 : f32
    %32 = vector.broadcast %cst_16 : f32 to vector<4x256xf32>
    %c0_17 = arith.constant 0 : index
    %c111 = arith.constant 111 : index
    %33 = vector.load %arg7[%c0_17, %c111] : memref<32x512xf32, #tpu.memory_space<vmem>>, vector<32x256xf32>
    %cst_18 = arith.constant 0.000000e+00 : f32
    %34 = vector.broadcast %cst_18 : f32 to vector<32x256xf32>
    %35 = vector.shape_cast %29 : vector<1x256xi1> to vector<1x256xi1>
    %36 = vector.broadcast %35 : vector<1x256xi1> to vector<32x256xi1>
    %37 = arith.select %36, %33, %34 : vector<32x256xi1>, vector<32x256xf32>
    %c0_19 = arith.constant 0 : index
    %c0_20 = arith.constant 0 : index
    %c0_21 = arith.constant 0 : index
    %38 = vector.load %arg4[%c0_19, %c0_20, %c0_21] : memref<9x4x32xf32, #tpu.memory_space<vmem>>, vector<1x4x32xf32>
    %39 = vector.shape_cast %38 : vector<1x4x32xf32> to vector<4x32xf32>
    %cst_22 = arith.constant dense<0.000000e+00> : vector<4x256xf32>
    %40 = tpu.matmul %39, %37, %cst_22 {dimension_numbers = #tpu.dot_dimension_numbers<[1], [0], [0], [1], [0, 0, 1, 1], [], []>} : vector<4x32xf32>, vector<32x256xf32>, vector<4x256xf32> -> vector<4x256xf32>
    %41 = arith.addf %32, %40 : vector<4x256xf32>
    %c0_23 = arith.constant 0 : index
    %c112 = arith.constant 112 : index
    %42 = vector.load %arg7[%c0_23, %c112] : memref<32x512xf32, #tpu.memory_space<vmem>>, vector<32x256xf32>
    %c1 = arith.constant 1 : index
    %c0_24 = arith.constant 0 : index
    %c0_25 = arith.constant 0 : index
    %43 = vector.load %arg4[%c1, %c0_24, %c0_25] : memref<9x4x32xf32, #tpu.memory_space<vmem>>, vector<1x4x32xf32>
    %44 = vector.shape_cast %43 : vector<1x4x32xf32> to vector<4x32xf32>
    %cst_26 = arith.constant dense<0.000000e+00> : vector<4x256xf32>
    %45 = tpu.matmul %44, %42, %cst_26 {dimension_numbers = #tpu.dot_dimension_numbers<[1], [0], [0], [1], [0, 0, 1, 1], [], []>} : vector<4x32xf32>, vector<32x256xf32>, vector<4x256xf32> -> vector<4x256xf32>
    %46 = arith.addf %41, %45 : vector<4x256xf32>
    %c0_27 = arith.constant 0 : index
    %c113 = arith.constant 113 : index
    %47 = vector.load %arg7[%c0_27, %c113] : memref<32x512xf32, #tpu.memory_space<vmem>>, vector<32x256xf32>
    %cst_28 = arith.constant 0.000000e+00 : f32
    %48 = vector.broadcast %cst_28 : f32 to vector<32x256xf32>
    %49 = vector.shape_cast %31 : vector<1x256xi1> to vector<1x256xi1>
    %50 = vector.broadcast %49 : vector<1x256xi1> to vector<32x256xi1>
    %51 = arith.select %50, %47, %48 : vector<32x256xi1>, vector<32x256xf32>
    %c2 = arith.constant 2 : index
    %c0_29 = arith.constant 0 : index
    %c0_30 = arith.constant 0 : index
    %52 = vector.load %arg4[%c2, %c0_29, %c0_30] : memref<9x4x32xf32, #tpu.memory_space<vmem>>, vector<1x4x32xf32>
    %53 = vector.shape_cast %52 : vector<1x4x32xf32> to vector<4x32xf32>
    %cst_31 = arith.constant dense<0.000000e+00> : vector<4x256xf32>
    %54 = tpu.matmul %53, %51, %cst_31 {dimension_numbers = #tpu.dot_dimension_numbers<[1], [0], [0], [1], [0, 0, 1, 1], [], []>} : vector<4x32xf32>, vector<32x256xf32>, vector<4x256xf32> -> vector<4x256xf32>
    %55 = arith.addf %46, %54 : vector<4x256xf32>
    %c0_32 = arith.constant 0 : index
    %c127 = arith.constant 127 : index
    %56 = vector.load %arg7[%c0_32, %c127] : memref<32x512xf32, #tpu.memory_space<vmem>>, vector<32x256xf32>
    %cst_33 = arith.constant 0.000000e+00 : f32
    %57 = vector.broadcast %cst_33 : f32 to vector<32x256xf32>
    %58 = vector.shape_cast %29 : vector<1x256xi1> to vector<1x256xi1>
    %59 = vector.broadcast %58 : vector<1x256xi1> to vector<32x256xi1>
    %60 = arith.select %59, %56, %57 : vector<32x256xi1>, vector<32x256xf32>
    %c3 = arith.constant 3 : index
    %c0_34 = arith.constant 0 : index
    %c0_35 = arith.constant 0 : index
    %61 = vector.load %arg4[%c3, %c0_34, %c0_35] : memref<9x4x32xf32, #tpu.memory_space<vmem>>, vector<1x4x32xf32>
    %62 = vector.shape_cast %61 : vector<1x4x32xf32> to vector<4x32xf32>
    %cst_36 = arith.constant dense<0.000000e+00> : vector<4x256xf32>
    %63 = tpu.matmul %62, %60, %cst_36 {dimension_numbers = #tpu.dot_dimension_numbers<[1], [0], [0], [1], [0, 0, 1, 1], [], []>} : vector<4x32xf32>, vector<32x256xf32>, vector<4x256xf32> -> vector<4x256xf32>
    %64 = arith.addf %55, %63 : vector<4x256xf32>
    %c0_37 = arith.constant 0 : index
    %c128_38 = arith.constant 128 : index
    %65 = vector.load %arg7[%c0_37, %c128_38] : memref<32x512xf32, #tpu.memory_space<vmem>>, vector<32x256xf32>
    %c4 = arith.constant 4 : index
    %c0_39 = arith.constant 0 : index
    %c0_40 = arith.constant 0 : index
    %66 = vector.load %arg4[%c4, %c0_39, %c0_40] : memref<9x4x32xf32, #tpu.memory_space<vmem>>, vector<1x4x32xf32>
    %67 = vector.shape_cast %66 : vector<1x4x32xf32> to vector<4x32xf32>
    %cst_41 = arith.constant dense<0.000000e+00> : vector<4x256xf32>
    %68 = tpu.matmul %67, %65, %cst_41 {dimension_numbers = #tpu.dot_dimension_numbers<[1], [0], [0], [1], [0, 0, 1, 1], [], []>} : vector<4x32xf32>, vector<32x256xf32>, vector<4x256xf32> -> vector<4x256xf32>
    %69 = arith.addf %64, %68 : vector<4x256xf32>
    %c0_42 = arith.constant 0 : index
    %c129 = arith.constant 129 : index
    %70 = vector.load %arg7[%c0_42, %c129] : memref<32x512xf32, #tpu.memory_space<vmem>>, vector<32x256xf32>
    %cst_43 = arith.constant 0.000000e+00 : f32
    %71 = vector.broadcast %cst_43 : f32 to vector<32x256xf32>
    %72 = vector.shape_cast %31 : vector<1x256xi1> to vector<1x256xi1>
    %73 = vector.broadcast %72 : vector<1x256xi1> to vector<32x256xi1>
    %74 = arith.select %73, %70, %71 : vector<32x256xi1>, vector<32x256xf32>
    %c5 = arith.constant 5 : index
    %c0_44 = arith.constant 0 : index
    %c0_45 = arith.constant 0 : index
    %75 = vector.load %arg4[%c5, %c0_44, %c0_45] : memref<9x4x32xf32, #tpu.memory_space<vmem>>, vector<1x4x32xf32>
    %76 = vector.shape_cast %75 : vector<1x4x32xf32> to vector<4x32xf32>
    %cst_46 = arith.constant dense<0.000000e+00> : vector<4x256xf32>
    %77 = tpu.matmul %76, %74, %cst_46 {dimension_numbers = #tpu.dot_dimension_numbers<[1], [0], [0], [1], [0, 0, 1, 1], [], []>} : vector<4x32xf32>, vector<32x256xf32>, vector<4x256xf32> -> vector<4x256xf32>
    %78 = arith.addf %69, %77 : vector<4x256xf32>
    %c0_47 = arith.constant 0 : index
    %c143 = arith.constant 143 : index
    %79 = vector.load %arg7[%c0_47, %c143] : memref<32x512xf32, #tpu.memory_space<vmem>>, vector<32x256xf32>
    %cst_48 = arith.constant 0.000000e+00 : f32
    %80 = vector.broadcast %cst_48 : f32 to vector<32x256xf32>
    %81 = vector.shape_cast %29 : vector<1x256xi1> to vector<1x256xi1>
    %82 = vector.broadcast %81 : vector<1x256xi1> to vector<32x256xi1>
    %83 = arith.select %82, %79, %80 : vector<32x256xi1>, vector<32x256xf32>
    %c6 = arith.constant 6 : index
    %c0_49 = arith.constant 0 : index
    %c0_50 = arith.constant 0 : index
    %84 = vector.load %arg4[%c6, %c0_49, %c0_50] : memref<9x4x32xf32, #tpu.memory_space<vmem>>, vector<1x4x32xf32>
    %85 = vector.shape_cast %84 : vector<1x4x32xf32> to vector<4x32xf32>
    %cst_51 = arith.constant dense<0.000000e+00> : vector<4x256xf32>
    %86 = tpu.matmul %85, %83, %cst_51 {dimension_numbers = #tpu.dot_dimension_numbers<[1], [0], [0], [1], [0, 0, 1, 1], [], []>} : vector<4x32xf32>, vector<32x256xf32>, vector<4x256xf32> -> vector<4x256xf32>
    %87 = arith.addf %78, %86 : vector<4x256xf32>
    %c0_52 = arith.constant 0 : index
    %c144 = arith.constant 144 : index
    %88 = vector.load %arg7[%c0_52, %c144] : memref<32x512xf32, #tpu.memory_space<vmem>>, vector<32x256xf32>
    %c7 = arith.constant 7 : index
    %c0_53 = arith.constant 0 : index
    %c0_54 = arith.constant 0 : index
    %89 = vector.load %arg4[%c7, %c0_53, %c0_54] : memref<9x4x32xf32, #tpu.memory_space<vmem>>, vector<1x4x32xf32>
    %90 = vector.shape_cast %89 : vector<1x4x32xf32> to vector<4x32xf32>
    %cst_55 = arith.constant dense<0.000000e+00> : vector<4x256xf32>
    %91 = tpu.matmul %90, %88, %cst_55 {dimension_numbers = #tpu.dot_dimension_numbers<[1], [0], [0], [1], [0, 0, 1, 1], [], []>} : vector<4x32xf32>, vector<32x256xf32>, vector<4x256xf32> -> vector<4x256xf32>
    %92 = arith.addf %87, %91 : vector<4x256xf32>
    %c0_56 = arith.constant 0 : index
    %c145 = arith.constant 145 : index
    %93 = vector.load %arg7[%c0_56, %c145] : memref<32x512xf32, #tpu.memory_space<vmem>>, vector<32x256xf32>
    %cst_57 = arith.constant 0.000000e+00 : f32
    %94 = vector.broadcast %cst_57 : f32 to vector<32x256xf32>
    %95 = vector.shape_cast %31 : vector<1x256xi1> to vector<1x256xi1>
    %96 = vector.broadcast %95 : vector<1x256xi1> to vector<32x256xi1>
    %97 = arith.select %96, %93, %94 : vector<32x256xi1>, vector<32x256xf32>
    %c8 = arith.constant 8 : index
    %c0_58 = arith.constant 0 : index
    %c0_59 = arith.constant 0 : index
    %98 = vector.load %arg4[%c8, %c0_58, %c0_59] : memref<9x4x32xf32, #tpu.memory_space<vmem>>, vector<1x4x32xf32>
    %99 = vector.shape_cast %98 : vector<1x4x32xf32> to vector<4x32xf32>
    %cst_60 = arith.constant dense<0.000000e+00> : vector<4x256xf32>
    %100 = tpu.matmul %99, %97, %cst_60 {dimension_numbers = #tpu.dot_dimension_numbers<[1], [0], [0], [1], [0, 0, 1, 1], [], []>} : vector<4x32xf32>, vector<32x256xf32>, vector<4x256xf32> -> vector<4x256xf32>
    %101 = arith.addf %92, %100 : vector<4x256xf32>
    %c0_61 = arith.constant 0 : index
    %c0_62 = arith.constant 0 : index
    %102 = vector.load %arg5[%c0_61, %c0_62] : memref<4x1xf32, #tpu.memory_space<vmem>>, vector<4x1xf32>
    %103 = vector.broadcast %102 : vector<4x1xf32> to vector<4x256xf32>
    %104 = arith.addf %101, %103 : vector<4x256xf32>
    %cst_63 = arith.constant 5.000000e-01 : f32
    %105 = vector.broadcast %cst_63 : f32 to vector<4x256xf32>
    %106 = arith.mulf %105, %104 : vector<4x256xf32>
    %cst_64 = arith.constant 0.707106769 : f32
    %107 = vector.broadcast %cst_64 : f32 to vector<4x256xf32>
    %108 = arith.mulf %104, %107 : vector<4x256xf32>
    %109 = math.erf %108 : vector<4x256xf32>
    %cst_65 = arith.constant 1.000000e+00 : f32
    %110 = vector.broadcast %cst_65 : f32 to vector<4x256xf32>
    %111 = arith.addf %110, %109 : vector<4x256xf32>
    %112 = arith.mulf %106, %111 : vector<4x256xf32>
    %c0_66 = arith.constant 0 : index
    %c0_67 = arith.constant 0 : index
    %c0_68 = arith.constant 0 : index
    %113 = vector.load %arg6[%c0_66, %c0_67, %c0_68] : memref<1x4x256xf32, #tpu.memory_space<vmem>>, vector<1x4x256xf32>
    %114 = vector.shape_cast %113 : vector<1x4x256xf32> to vector<4x256xf32>
    %115 = vector.shape_cast %112 : vector<4x256xf32> to vector<1x4x256xf32>
    tpu.vector_store %arg6[%c0_66, %c0_67, %c0_68], %115 {strides = array<i32>} : memref<1x4x256xf32, #tpu.memory_space<vmem>>, vector<1x4x256xf32>,
    return
  }
  func.func @transform_0(%arg0: i32) -> (i32, i32, i32) {
    %c0_i32 = arith.constant 0 : i32
    %c0_i32_0 = arith.constant 0 : i32
    %c0_i32_1 = arith.constant 0 : i32
    return %arg0, %c0_i32, %c0_i32_0 : i32, i32, i32
  }
  func.func @transform_1(%arg0: i32) -> (i32, i32) {
    %c0_i32 = arith.constant 0 : i32
    %c0_i32_0 = arith.constant 0 : i32
    %c0_i32_1 = arith.constant 0 : i32
    return %c0_i32, %c0_i32_0 : i32, i32
  }
  func.func @transform_2(%arg0: i32) -> (i32, i32) {
    %c0_i32 = arith.constant 0 : i32
    %c0_i32_0 = arith.constant 0 : i32
    %c0_i32_1 = arith.constant 0 : i32
    return %c0_i32, %c0_i32_0 : i32, i32
  }
  func.func @transform_3(%arg0: i32) -> (i32, i32, i32) {
    %c0_i32 = arith.constant 0 : i32
    %c0_i32_0 = arith.constant 0 : i32
    %c0_i32_1 = arith.constant 0 : i32
    %c0_i32_2 = arith.constant 0 : i32
    return %c0_i32, %c0_i32_0, %c0_i32_1 : i32, i32, i32
  }
  func.func @transform_4(%arg0: i32) -> (i32, i32) {
    %c0_i32 = arith.constant 0 : i32
    %c0_i32_0 = arith.constant 0 : i32
    %c0_i32_1 = arith.constant 0 : i32
    return %c0_i32, %c0_i32_0 : i32, i32
  }
  func.func @transform_5(%arg0: i32) -> (i32, i32, i32) {
    %c0_i32 = arith.constant 0 : i32
    %c0_i32_0 = arith.constant 0 : i32
    %c0_i32_1 = arith.constant 0 : i32
    return %arg0, %c0_i32, %c0_i32_0 : i32, i32, i32
  }
}

</mosaic_0001>

<bundles_post_ra>
// kernel: tpu_custom_call.1
= control target key start
LH: loop header
LB: loop body
LE: loop exit
PB: predicated region body
PF: predicated region fallthrough
CT: control target
= control target key end

     0   :  { %10 = vsyncpa [#allocation4], 0  ;;  %s2876_s0 = inlined_call_operand.vmem [shape: f32[2,32,8], index: 0, kind: input, shape index: {}]   ;;  %s2877_s1 = inlined_call_operand.vmem [shape: f32[8,256], index: 1, kind: input, shape index: {}]   ;;  %s2878_s2 = inlined_call_operand.vmem [shape: f32[1,256], index: 2, kind: input, shape index: {}]   ;;  %s2879_s3 = inlined_call_operand.vmem [shape: f32[9,4,32], index: 3, kind: input, shape index: {}]   ;;  %s2880_s4 = inlined_call_operand.vmem [shape: f32[4,1], index: 4, kind: input, shape index: {}]   ;;  %s2881_s5 = inlined_call_operand.hbm [shape: f32[2,4,256], index: 5, kind: output, shape index: {}]  }
   0x1   :  { %12 = vsyncpa [#allocation4 + $0x1], 0  ;;  %s2277_s18 = smov 0   ;;  %s2279_s19 = smov 0  }
   0x2   :  { %s2281_s20 = smov 0   ;;  %s2283_s21 = smov 0  }
   0x3 LB: > { %s2298_s22 = sadd.s32 4294967295, %s2234_s21   ;;  %s1667_s23 = sadd.s32 4294967294, %s2234_s21   ;;  %s2234_s21 = sphi %s2283_s21, %s2900_s21   ;;  %s2230_s20 = sphi %s2281_s20, %s2899_s20   ;;  %s2226_s19 = sphi %s2279_s19, %s2898_s19   ;;  %s2222_s18 = sphi %s2277_s18, %s2897_s18  }
   0x4   : > { %s2302_s24 = sadd.s32 1, %s2234_s21   ;;  %s135_s25 = sadd.s32 1, %s2230_s20 }
   0x5   : > { %s132_s26 = ssub.s32 %s2234_s21, %s2302_s24  ;;  %p145_p0 = scmp.ne.s32.totalorder %s2230_s20, %s2226_s19 }
   0x6   : > { %p133_p1 = scmp.eq.s32.totalorder %s132_s26, 0  ;;  %p146_p2 = scmp.eq.s32.totalorder %s2298_s22, 1 }
   0x7   : > { %p151_p3 = scmp.ne.s32.totalorder %s2226_s19, %s2222_s18  ;;  %p152_p4 = scmp.eq.s32.totalorder %s1667_s23, 1 }
   0x8   : > { %s2313_s27 = scalar_select %p133_p1, %s2230_s20, %s135_s25  }
   0x9   : > { %p2315_p5 = por %p146_p2, %p145_p0  ;;  %p2319_p6 = por %p152_p4, %p151_p3 }
   0xa   : > { %p1670_p7 = scmp.ge.s32.totalorder %s2234_s21, 1  ;;  %p190_p8 = scmp.lt.s32.totalorder %s2234_s21, 3 }
   0xc   : > { %p191_p9 = pnand %p1670_p7, %p190_p8 }
   0xd   : > { %v228_v0 = vld [vmem:[%s2877_s1 + $0x8] sm:$0xff] (!%p191_p9)  ;;  %v227_v1 = vld [vmem:[%s2877_s1] sm:$0xff] (!%p191_p9)  ;;  %p218_p10 = scmp.lt.s32.totalorder (!%p191_p9), %s2298_s22, 1  ;;  %v2236_v2 = vmov (!%p191_p9), 0.0   ;;  %vm241_vm0 = vcmask (!%p191_p9), 64512   ;;  %s2237_s14 = smov (!%p191_p9), 16   ;;  %v231_v7 = vlaneseq (!%p191_p9) }
   0xe   : > { %194 = sbr.rel (%p191_p9) target bundleno = 733 (0x2dd), region = 40  ;;  %254 = vmatprep.subr.mxu0 (!%p191_p9), %v228_v0  ;;  %318 = vmatprep.mubr.f32.mxu0 (!%p191_p9), %v2236_v2  ;;  %s2238_s15 = smov (!%p191_p9), 17   ;;  %v229_v10 = vld [vmem:[%s2878_s2] sm:$0x3] (!%p191_p9)  ;;  %vm561_vm1 = vcmask (!%p191_p9), 261120   ;;  %vm1094_vm2 = vcmask (!%p191_p9), 1039360  }
   0xf   : > { %255 = vmatpush1.msra.mxu0 (!%p191_p9), %v227_v1  ;;  %1037 = vmatprep.mubr.f32.mxu1 (!%p191_p9), %v2236_v2  ;;  %s2239_s16 = smov (!%p191_p9), 15   ;;  %s2240_s17 = smov (!%p191_p9), 1   ;;  %v232_v8 = vshrl.u32 (!%p191_p9), %v231_v7, 7  ;;  %vm544_vm7 = vcmask (!%p191_p9), 130048   ;;  %vm492_vm8 = vcmask (!%p191_p9), 138240   ;;  %vm1221_vm9 = vcmask (!%p191_p9), 924672  }
  0x10   : > { %1912 = vrot.lane.b32.xlu0 (!%p191_p9), %v2236_v2, %s2237_s14  ;;  %s2241_s26 = smov (!%p191_p9), 127   ;;  %s2242_s30 = smov (!%p191_p9), 113   ;;  %vm738_vm10 = vcmask (!%p191_p9), 121856   ;;  %vm1350_vm11 = vcmask (!%p191_p9), 916480   ;;  %vm865_vm12 = vcmask (!%p191_p9), 7168  }
  0x11   : > { %v233_v9 = vsub.s32 (!%p191_p9), 0, %v232_v8  ;;  %v237_v11 = vsub.s32 (!%p191_p9), 1, %v232_v8  ;;  %s2243_s6 = smov (!%p191_p9), 112   ;;  %s215_s12 = sand.u32 (!%p191_p9), 1, %s2226_s19  }
  0x13   : > { %v234_v12 = vrot.slane (!%p191_p9), %v229_v10, %v233_v9  ;;  %v238_v13 = vrot.slane (!%p191_p9), %v229_v10, %v237_v11 }
  0x14   : > { %1917 = vrot.lane.b32.xlu0 (!%p191_p9), %v2236_v2, %s2237_s14 }
  0x15   : > { %s219_s9 = scalar_select %p218_p10, %s2298_s22, 1 }
  0x17   : > { %s1748_s10 = sshll.u32 %s219_s9, 5  ;;  %s2244_s9 = smov 111  }
  0x18   : > { %s222_s13 = scalar_lea.vmem %s2876_s0, %s1748_s10  ;;  %1922 = vrot.lane.b32.xlu0 %v2236_v2, %s2238_s15 }
  0x19   : > { %v223_v3 = vld [vmem:[%s222_s13] sm:$0xff]  ;;  %v224_v4 = vld [vmem:[%s222_s13 + $0x8] sm:$0xff]  ;;  %v225_v5 = vld [vmem:[%s222_s13 + $0x10] sm:$0xff] }
  0x1a   : > { %1674 = vmatmul.mubr.msk.f32.vlgmr.msra.gmra.mrb[0].mxu0 %vm241_vm0, %v223_v3  ;;  %v226_v6 = vld [vmem:[%s222_s13 + $0x18] sm:$0xff]  ;;  %s1671_s13 = sshll.u32 %s215_s12, 3 }
  0x1b   : > { %324 = vmatprep.mubr.f32.mxu0 %v2236_v2 }
  0x1c   : > { %1927 = vrot.lane.b32.xlu0 %v2236_v2, %s2238_s15 }
  0x1e   : > { %1675 = vmatmul.mubr.msk.f32.gmra.mrb[2].mxu0 %vm241_vm0, %v224_v4 }
  0x1f   : > { %330 = vmatprep.mubr.f32.mxu0 %v2236_v2 }
  0x20   : > { %1932 = vrot.lane.b32.xlu0 %v2236_v2, %s2239_s16 }
  0x22   : > { %1676 = vmatmul.mubr.msk.f32.gmra.mrb[4].mxu0 %vm241_vm0, %v225_v5 }
  0x23   : > { %336 = vmatprep.mubr.f32.mxu0 %v2236_v2 }
  0x24   : > { %1937 = vrot.lane.b32.xlu0 %v2236_v2, %s2239_s16 }
  0x26   : > { %1677 = vmatmul.mubr.msk.f32.gmra.mrb[6].mxu0 %vm241_vm0, %v226_v6 }
  0x27   : > { %629 = vmatprep.mubr.f32.mxu0 %v2236_v2 }
  0x28   : > { %1942 = vrot.lane.b32.xlu0 %v2236_v2, %s2240_s17 }
  0xed   : > { %v320_v14 = vpop.f32.mrb[0].mxu0 }
  0xee   : > { %v321_v15 = vadd.f32 %v320_v14, %v234_v12  ;;  %v322_v16 = vpop.f32.mrb[1].mxu0 }
  0xef   : > { %v323_v17 = vadd.f32 %v322_v16, %v238_v13 }
  0xf0   : > { %v351_v18 = vmul.f32 %v321_v15, %v321_v15  ;;  %v343_v9 = vmul.f32 0.5, %v321_v15 }
  0xf1   : > { %v352_v19 = vmul.f32 %v323_v17, %v323_v17  ;;  %v326_v20 = vpop.f32.mrb[2].mxu0 }
  0xf2   : > { %v359_v21 = vmul.f32 %v351_v18, %v321_v15  ;;  %v2360_v22 = vadd.f32 %v326_v20, %v234_v12  ;;  %v328_v23 = vpop.f32.mrb[3].mxu0 }
  0xf3   : > { %v360_v24 = vmul.f32 %v352_v19, %v323_v17  ;;  %v2362_v25 = vadd.f32 %v328_v23, %v238_v13 }
  0xf4   : > { %v367_v26 = vmul.f32 0.044715, %v359_v21  ;;  %v353_v27 = vmul.f32 %v2360_v22, %v2360_v22  ;;  %v345_v20 = vmul.f32 0.5, %v2360_v22 }
  0xf5   : > { %v368_v28 = vmul.f32 0.044715, %v360_v24  ;;  %v354_v29 = vmul.f32 %v2362_v25, %v2362_v25  ;;  %v332_v30 = vpop.f32.mrb[4].mxu0  ;;  %v346_v23 = vmul.f32 0.5, %v2362_v25 }
  0xf6   : > { %v375_v31 = vadd.f32 %v367_v26, %v321_v15  ;;  %v361_v32 = vmul.f32 %v353_v27, %v2360_v22  ;;  %v333_v33 = vadd.f32 %v332_v30, %v234_v12  ;;  %v334_v34 = vpop.f32.mrb[5].mxu0 }
  0xf7   : > { %v376_v35 = vadd.f32 %v368_v28, %v323_v17  ;;  %v362_v36 = vmul.f32 %v354_v29, %v2362_v25  ;;  %v335_v37 = vadd.f32 %v334_v34, %v238_v13 }
  0xf8   : > { %v383_v38 = vmul.f32 0.7978846, %v375_v31  ;;  %v369_v39 = vmul.f32 0.044715, %v361_v32  ;;  %v355_v40 = vmul.f32 %v333_v33, %v333_v33  ;;  %v347_v28 = vmul.f32 0.5, %v333_v33 }
  0xf9   : > { %v384_v41 = vmul.f32 0.7978846, %v376_v35  ;;  %v370_v42 = vmul.f32 0.044715, %v362_v36  ;;  %v356_v43 = vmul.f32 %v335_v37, %v335_v37  ;;  %v338_v44 = vpop.f32.mrb[6].mxu0  ;;  %v348_v30 = vmul.f32 0.5, %v335_v37 }
  0xfa   : > { %2152 = vtanh.f32 %v383_v38  ;;  %v377_v45 = vadd.f32 %v369_v39, %v2360_v22  ;;  %v363_v46 = vmul.f32 %v355_v40, %v333_v33  ;;  %v339_v47 = vadd.f32 %v338_v44, %v234_v12  ;;  %v340_v48 = vpop.f32.mrb[7].mxu0 }
  0xfb   : > { %2154 = vtanh.f32 %v384_v41  ;;  %v378_v49 = vadd.f32 %v370_v42, %v2362_v25  ;;  %v364_v50 = vmul.f32 %v356_v43, %v335_v37  ;;  %v341_v51 = vadd.f32 %v340_v48, %v238_v13 }
  0xfc   : > { %v385_v52 = vmul.f32 0.7978846, %v377_v45  ;;  %v371_v53 = vmul.f32 0.044715, %v363_v46  ;;  %v357_v54 = vmul.f32 %v339_v47, %v339_v47  ;;  %v344_v12 = vmul.f32 0.5, %v323_v17 }
  0xfd   : > { %v386_v55 = vmul.f32 0.7978846, %v378_v49  ;;  %v372_v56 = vmul.f32 0.044715, %v364_v50  ;;  %v358_v57 = vmul.f32 %v341_v51, %v341_v51  ;;  %v349_v38 = vmul.f32 0.5, %v339_v47 }
  0xfe   : > { %2156 = vtanh.f32 %v385_v52  ;;  %v379_v58 = vadd.f32 %v371_v53, %v333_v33  ;;  %v365_v59 = vmul.f32 %v357_v54, %v339_v47  ;;  %v350_v33 = vmul.f32 0.5, %v341_v51 }
  0xff   : > { %2158 = vtanh.f32 %v386_v55  ;;  %v380_v60 = vadd.f32 %v372_v56, %v335_v37  ;;  %v366_v61 = vmul.f32 %v358_v57, %v341_v51  ;;  %v2420_v55 = vpop.permute.xlu0 %1912 }
 0x100   : > { %v387_v62 = vmul.f32 0.7978846, %v379_v58  ;;  %v373_v63 = vmul.f32 0.044715, %v365_v59  ;;  %v1570_v58 = vld [vmem:[%s2880_s4] sm:$0xf] }
 0x101   : > { %v388_v0 = vmul.f32 0.7978846, %v380_v60  ;;  %v374_v1 = vmul.f32 0.044715, %v366_v61  ;;  %v2245_v59 = vmov 0  }
 0x102   : > { %2160 = vtanh.f32 %v387_v62  ;;  %v381_v3 = vadd.f32 %v373_v63, %v339_v47  ;;  %2151 = vset.pattern.permute.xlu0 %v2245_v59 }
 0x103   : > { %2162 = vtanh.f32 %v388_v0  ;;  %v382_v4 = vadd.f32 %v374_v1, %v341_v51  ;;  %v1709_v51 = vld [vmem:[%s2879_s3 + $0x10] sm:$0xf]  ;;  %v2423_v56 = vpop.permute.xlu0 %1917 }
 0x104   : > { %v2153_v5 = vpop.eup %2152  ;;  %v389_v6 = vmul.f32 0.7978846, %v381_v3 }
 0x105   : > { %v2155_v8 = vpop.eup %2154  ;;  %v399_v10 = vadd.f32 1.0, %v2153_v5  ;;  %v390_v11 = vmul.f32 0.7978846, %v382_v4 }
 0x106   : > { %v400_v13 = vadd.f32 1.0, %v2155_v8  ;;  %2164 = vtanh.f32 %v389_v6  ;;  %v2447_v6 = vand.u32 127, %v231_v7 }
 0x107   : > { %v407_v14 = vmul.f32 %v399_v10, %v343_v9  ;;  %2166 = vtanh.f32 %v390_v11  ;;  %v2427_v57 = vpop.permute.xlu0 %1922 }
 0x108   : > { %v2157_v16 = vpop.eup %2156  ;;  %v408_v18 = vmul.f32 %v400_v13, %v344_v12  ;;  %v2454_v10 = vadd.s32 128, %v2447_v6  ;;  %v1924_v59 = vunpack.i.l.bf16 %v2427_v57 }
 0x109   : > { %v2159_v19 = vpop.eup %2158  ;;  %v401_v21 = vadd.f32 1.0, %v2157_v16  ;;  %v434_v16 = vand.u32 15, %v2447_v6 }
 0x10a   : > { %v402_v24 = vadd.f32 1.0, %v2159_v19  ;;  %v1951_v26 = vpack.i.bf16 %v2236_v2, %v408_v18  ;;  %v1946_v27 = vpack.i.bf16 %v408_v18, %v407_v14  ;;  %v435_v13 = vand.u32 15, %v2454_v10 }
 0x10b   : > { %v409_v15 = vmul.f32 %v401_v21, %v345_v20  ;;  %v2433_v60 = vpop.permute.xlu0 %1927  ;;  %vm438_vm4 = vcmp.le.s32.totalorder %v434_v16, 14  ;;  %vm2572_vm14 = vcmp.ge.s32.totalorder %v434_v16, 1 }
 0x10c   : > { %v2161_v29 = vpop.eup %2160  ;;  %v410_v17 = vmul.f32 %v402_v24, %v346_v23  ;;  %1952 = vrot.lane.b32.xlu1 %v1951_v26, %s2241_s26  ;;  %1947 = vrot.lane.b32.xlu0 %v1946_v27, %s2237_s14  ;;  %vm439_vm3 = vcmp.le.s32.totalorder %v435_v13, 14  ;;  %vm2480_vm6 = vmpackc.low %vm438_vm4, %vm438_vm4  ;;  %vm2546_vm13 = vcmp.ge.s32.totalorder %v435_v13, 1 }
 0x10d   : > { %v2163_v31 = vpop.eup %2162  ;;  %v403_v32 = vadd.f32 1.0, %v2161_v29  ;;  %v1986_v22 = vpack.i.bf16 %v409_v15, %v407_v14  ;;  %v1796_v34 = vpack.c.bf16 %v409_v15, %v407_v14  ;;  %vm2474_vm5 = vmpackc.low %vm439_vm3, %vm439_vm3 }
 0x10e   : > { %v404_v35 = vadd.f32 1.0, %v2163_v31  ;;  %v1794_v25 = vpack.c.bf16 %v410_v17, %v408_v18  ;;  %v2016_v39 = vpack.i.bf16 %v410_v17, %v409_v15  ;;  %v2011_v52 = vpack.i.bf16 %v2236_v2, %v410_v17  ;;  %vm2630_vm15 = vmpackc.low %vm2546_vm13, %vm2546_vm13 }
 0x10f   : > { %v411_v36 = vmul.f32 %v403_v32, %v347_v28  ;;  %v2436_v61 = vpop.permute.xlu0 %1932  ;;  %vm2660_vm0 = vmpackc.low %vm2572_vm14, %vm2572_vm14 }
 0x110   : > { %v2165_v40 = vpop.eup %2164  ;;  %v412_v41 = vmul.f32 %v404_v35, %v348_v30  ;;  %1795 = vmatprep.subr.bf16.mxu1 %v1794_v25  ;;  %1987 = vrot.lane.b32.xlu1 %v1986_v22, %s2241_s26  ;;  %v1914_v35 = vunpack.i.l.bf16 %v2420_v55 }
 0x111   : > { %v2167_v37 = vpop.eup %2166  ;;  %v405_v42 = vadd.f32 1.0, %v2165_v40  ;;  %1957 = vrot.lane.b32.xlu0 %v1946_v27, %s2238_s15  ;;  %1797 = vmatpush1.bf16.msra.mxu1 %v1796_v34  ;;  %v1915_v40 = vunpack.i.h.bf16 %v2420_v55  ;;  %v1919_v55 = vunpack.i.l.bf16 %v2423_v56 }
 0x112   : > { %v406_v43 = vadd.f32 1.0, %v2167_v37  ;;  %v2046_v44 = vpack.i.bf16 %v412_v41, %v411_v36  ;;  %v2051_v53 = vpack.i.bf16 %v2236_v2, %v412_v41 }
 0x113   : > { %v413_v45 = vmul.f32 %v405_v42, %v349_v38  ;;  %v2438_v62 = vpop.permute.xlu0 %1937 }
 0x114   : > { %v414_v46 = vmul.f32 %v406_v43, %v350_v33  ;;  %1992 = vrot.lane.b32.xlu1 %v1986_v22, %s2242_s30 }
 0x115   : > { %1962 = vrot.lane.b32.xlu0 %v1951_v26, %s2242_s30  ;;  %v1800_v47 = vpack.c.bf16 %v413_v45, %v411_v36  ;;  %v2091_v48 = vpack.i.bf16 %v413_v45, %v411_v36 }
 0x116   : > { %v1798_v49 = vpack.c.bf16 %v414_v46, %v412_v41  ;;  %v2106_v50 = vpack.i.bf16 %v414_v46, %v413_v45  ;;  %v2111_v54 = vpack.i.bf16 %v2236_v2, %v414_v46 }
 0x117   : > { %v2440_v63 = vpop.permute.xlu0 %1942 }
 0x118   : > { %1997 = vrot.lane.b32.xlu1 %v1986_v22, %s2243_s6  ;;  %1799 = vmatprep.subr.bf16.mxu1 %v1798_v49 }
 0x119   : > { %1967 = vrot.lane.b32.xlu0 %v1946_v27, %s2239_s16  ;;  %1801 = vmatpush1.bf16.msra.mxu1 %v1800_v47 }
 0x11c   : > { %2002 = vrot.lane.b32.xlu1 %v1986_v22, %s2244_s9  ;;  %1710 = vmatmul.mubr.msk.f32.vlgmr.msra.gmra.mrb[0].mxu1 %vm561_vm1, %v1709_v51 }
 0x11d   : > { %1972 = vrot.lane.b32.xlu0 %v1951_v26, %s2243_s6  ;;  %1188 = vmatprep.mubr.f32.mxu1 %v2236_v2 }
 0x120   : > { %2012 = vrot.lane.b32.xlu1 %v2011_v52, %s2241_s26 }
 0x121   : > { %1977 = vrot.lane.b32.xlu0 %v1946_v27, %s2240_s17 }
 0x124   : > { %2017 = vrot.lane.b32.xlu1 %v2016_v39, %s2238_s15 }
 0x125   : > { %1982 = vrot.lane.b32.xlu0 %v1951_v26, %s2244_s9 }
 0x128   : > { %2022 = vrot.lane.b32.xlu1 %v2011_v52, %s2242_s30 }
 0x129   : > { %2007 = vrot.lane.b32.xlu0 %v2016_v39, %s2237_s14 }
 0x12c   : > { %2027 = vrot.lane.b32.xlu1 %v2016_v39, %s2239_s16 }
 0x12d   : > { %2047 = vrot.lane.b32.xlu0 %v2046_v44, %s2237_s14 }
 0x130   : > { %2032 = vrot.lane.b32.xlu1 %v2011_v52, %s2243_s6 }
 0x131   : > { %2052 = vrot.lane.b32.xlu0 %v2051_v53, %s2241_s26 }
 0x134   : > { %2037 = vrot.lane.b32.xlu1 %v2016_v39, %s2240_s17 }
 0x135   : > { %2057 = vrot.lane.b32.xlu0 %v2046_v44, %s2238_s15 }
 0x138   : > { %2042 = vrot.lane.b32.xlu1 %v2011_v52, %s2244_s9 }
 0x139   : > { %2062 = vrot.lane.b32.xlu0 %v2051_v53, %s2242_s30 }
 0x13c   : > { %2092 = vrot.lane.b32.xlu1 %v2091_v48, %s2241_s26 }
 0x13d   : > { %2067 = vrot.lane.b32.xlu0 %v2046_v44, %s2239_s16 }
 0x140   : > { %2097 = vrot.lane.b32.xlu1 %v2091_v48, %s2242_s30 }
 0x141   : > { %2072 = vrot.lane.b32.xlu0 %v2051_v53, %s2243_s6 }
 0x144   : > { %2102 = vrot.lane.b32.xlu1 %v2091_v48, %s2243_s6 }
 0x145   : > { %2077 = vrot.lane.b32.xlu0 %v2046_v44, %s2240_s17 }
 0x148   : > { %2107 = vrot.lane.b32.xlu1 %v2106_v50, %s2237_s14  ;;  %s1749_s14 = sshll.u32 %s2298_s22, 7  ;;  %s2246_s22 = smov [#allocation3]  }
 0x149   : > { %2082 = vrot.lane.b32.xlu0 %v2051_v53, %s2244_s9  ;;  %s2834_s25 = scalar_lea.hbm %s2881_s5, %s1749_s14 }
 0x14c   : > { %2112 = vrot.lane.b32.xlu1 %v2111_v54, %s2241_s26  ;;  %s1594_s26 = scalar_lea.sflag [#allocation4], %s215_s12 }
 0x14d   : > { %2087 = vrot.lane.b32.xlu0 %v2236_v2, %s2240_s17 }
 0x150   : > { %2117 = vrot.lane.b32.xlu1 %v2106_v50, %s2238_s15  ;;  %s217_s15 = scalar_lea.vmem [#allocation3], %s1671_s13 }
 0x151   : > { %1573 = vperm.xlu0 %2151, %v1570_v58   ;;  %v1925_v58 = vunpack.i.h.bf16 %v2427_v57  ;;  %v1945_v57 = vunpack.i.h.bf16 %v2440_v63 }
 0x154   : > { %2122 = vrot.lane.b32.xlu1 %v2111_v54, %s2242_s30 }
 0x158   : > { %2127 = vrot.lane.b32.xlu1 %v2106_v50, %s2239_s16  ;;  %s1608_s16 = sshll.u32 %s217_s15, 4  ;;  %s2836_s16 = int_to_ptr.vmem [resolvable:$true] %s1608_s16 }
 0x159   : > { %s2172_s30 = scalar_lea.vmem %s2836_s16, 128 }
 0x15a   : > { %p2173_p11 = scmp.ne.s32.totalorder %s2836_s16, %s2172_s30 }
 0x15c   : > { %2132 = vrot.lane.b32.xlu1 %v2111_v54, %s2243_s6  ;;  %p2174_p12 = pnand %p2173_p11, %p2315_p5  ;;  %s2176_s6 = sshll.u32 %s2246_s22, 4  ;;  %s2177_s6 = int_to_ptr.vmem [resolvable:$false] %s2176_s6 }
 0x15d   : > { %s2178_s7 = scalar_lea.vmem %s2177_s6, 256  ;;  %p2179_p0 = scmp.lt.s32.totalorder %s2836_s16, %s2177_s6 }
 0x15e   : > { %p2175_p13 = pneg %p2174_p12  ;;  %p2180_p1 = scmp.lt.s32.totalorder %s2178_s7, %s2172_s30 }
 0x160   : > { %2137 = vrot.lane.b32.xlu1 %v2106_v50, %s2240_s17  ;;  %p2181_p2 = por %p2180_p1, %p2179_p0 }
 0x162   : > { %p2182_p3 = pnand %p2181_p2, %p2175_p13 }
 0x164   : > { %2142 = vrot.lane.b32.xlu1 %v2111_v54, %s2244_s9  ;;  %v1920_v54 = vunpack.i.h.bf16 %v2423_v56 }
 0x168   : > { %2147 = vrot.lane.b32.xlu1 %v2091_v48, %s2244_s9 }
 0x17e   : > { %v1953_v0 = vpop.permute.xlu1 %1952  ;;  %v1948_v1 = vpop.permute.xlu0 %1947 }
 0x17f   : > { %v1955_v18 = vunpack.i.h.bf16 %v1953_v0  ;;  %v1954_v7 = vunpack.i.l.bf16 %v1953_v0  ;;  %v1950_v25 = vunpack.i.h.bf16 %v1948_v1  ;;  %v1949_v36 = vunpack.i.l.bf16 %v1948_v1 }
 0x180   : > { %v1930_v1 = vunpack.i.h.bf16 %v2433_v60 }
 0x181   : > { %v1096_v27 = vsel %vm1094_vm2, %v1954_v7, %v1955_v18  ;;  %v545_v37 = vsel %vm544_vm7, %v1914_v35, %v1949_v36  ;;  %v546_v44 = vsel %vm544_vm7, %v1949_v36, %v1950_v25  ;;  %v1935_v18 = vunpack.i.h.bf16 %v2436_v61 }
 0x182   : > { %v1988_v3 = vpop.permute.xlu1 %1987 }
 0x183   : > { %v2442_v4 = vpop.permute.xlu0 %1957  ;;  %v1989_v19 = vunpack.i.l.bf16 %v1988_v3  ;;  %v1990_v21 = vunpack.i.h.bf16 %v1988_v3  ;;  %v1929_v3 = vunpack.i.l.bf16 %v2433_v60 }
 0x185   : > { %v1095_v15 = vsel %vm1094_vm2, %v1989_v19, %v1954_v7  ;;  %v1934_v7 = vunpack.i.l.bf16 %v2436_v61  ;;  %v1940_v19 = vunpack.i.h.bf16 %v2438_v62 }
 0x186   : > { %v2444_v5 = vpop.permute.xlu1 %1992 }
 0x187   : > { %v2449_v8 = vpop.permute.xlu0 %1962 }
 0x18a   : > { %v2451_v9 = vpop.permute.xlu1 %1997 }
 0x18b   : > { %v2456_v11 = vpop.permute.xlu0 %1967 }
 0x18c   : > { %v1969_v36 = vunpack.i.l.bf16 %v2456_v11 }
 0x18e   : > { %v2458_v12 = vpop.permute.xlu1 %2002 }
 0x18f   : > { %v2461_v14 = vpop.permute.xlu0 %1972 }
 0x192   : > { %v2013_v20 = vpop.permute.xlu1 %2012 }
 0x193   : > { %v2015_v23 = vunpack.i.h.bf16 %v2013_v20  ;;  %v2014_v24 = vunpack.i.l.bf16 %v2013_v20  ;;  %v2466_v26 = vpop.permute.xlu0 %1977  ;;  %v1939_v20 = vunpack.i.l.bf16 %v2438_v62 }
 0x194   : > { %v1980_v10 = vunpack.i.h.bf16 %v2466_v26  ;;  %v1979_v13 = vunpack.i.l.bf16 %v2466_v26 }
 0x195   : > { %v1097_v28 = vsel %vm1094_vm2, %v1990_v21, %v2014_v24  ;;  %v1098_v29 = vsel %vm1094_vm2, %v2014_v24, %v2015_v23  ;;  %v1960_v21 = vunpack.i.h.bf16 %v2442_v4  ;;  %v1959_v23 = vunpack.i.l.bf16 %v2442_v4 }
 0x196   : > { %v1802_v30 = vpack.c.bf16 %v1098_v29, %v1096_v27  ;;  %v1805_v31 = vpack.c.bf16 %v1097_v28, %v1095_v15  ;;  %v2478_v32 = vpop.permute.xlu1 %2017  ;;  %v1994_v15 = vunpack.i.l.bf16 %v2444_v5  ;;  %v1965_v28 = vunpack.i.h.bf16 %v2449_v8 }
 0x197   : > { %v2484_v34 = vpop.permute.xlu0 %1982  ;;  %v1964_v29 = vunpack.i.l.bf16 %v2449_v8  ;;  %v2020_v4 = vunpack.i.h.bf16 %v2478_v32  ;;  %v2538_v35 = vsel %vm492_vm8, %v1924_v59, %v1959_v23  ;;  %v2541_v25 = vsel %vm492_vm8, %v1959_v23, %v1960_v21 }
 0x198   : > { %1804 = vmatprep.subr.msk.bf16.mxu1 %vm2474_vm5, %v1802_v30 }
 0x199   : > { %1807 = vmatpush1.bf16.msk.msra.mxu1 %vm2480_vm6, %v1805_v31  ;;  %v2019_v31 = vunpack.i.l.bf16 %v2478_v32  ;;  %v1975_v32 = vunpack.i.h.bf16 %v2461_v14 }
 0x19a   : > { %v2491_v38 = vpop.permute.xlu1 %2022 }
 0x19b   : > { %v2008_v39 = vpop.permute.xlu0 %2007  ;;  %v2580_v59 = vsel %vm492_vm8, %v1925_v58, %v2019_v31  ;;  %v2025_v21 = vunpack.i.h.bf16 %v2491_v38  ;;  %v2597_v58 = vsel %vm865_vm12, %v1979_v13, %v1980_v10 }
 0x19c   : > { %v2010_v41 = vunpack.i.h.bf16 %v2008_v39  ;;  %v2009_v33 = vunpack.i.l.bf16 %v2008_v39  ;;  %v1995_v39 = vunpack.i.h.bf16 %v2444_v5  ;;  %v2000_v5 = vunpack.i.h.bf16 %v2451_v9 }
 0x19e   : > { %v547_v42 = vsel %vm544_vm7, %v1915_v40, %v2009_v33  ;;  %v2496_v43 = vpop.permute.xlu1 %2027  ;;  %v548_v45 = vsel %vm544_vm7, %v2009_v33, %v2010_v41  ;;  %v1970_v40 = vunpack.i.h.bf16 %v2456_v11  ;;  %v1974_v41 = vunpack.i.l.bf16 %v2461_v14 }
 0x19f   : > { %v1752_v46 = vpack.c.bf16 %v547_v42, %v545_v37  ;;  %v2500_v47 = vpop.permute.xlu0 %2047  ;;  %v1750_v48 = vpack.c.bf16 %v548_v45, %v546_v44  ;;  %v2555_v33 = vsel %vm1221_vm9, %v1994_v15, %v1964_v29  ;;  %v2558_v37 = vsel %vm1221_vm9, %v1964_v29, %v1965_v28 }
 0x1a0   : > { %v1999_v11 = vunpack.i.l.bf16 %v2451_v9  ;;  %v496_v14 = vsel %vm492_vm8, %v2019_v31, %v2020_v4  ;;  %v2024_v45 = vunpack.i.l.bf16 %v2491_v38  ;;  %v2049_v9 = vunpack.i.l.bf16 %v2500_v47 }
 0x1a1   : > { %1751 = vmatprep.subr.bf16.mxu0 %v1750_v48  ;;  %v2577_v48 = vsel %vm738_vm10, %v1934_v7, %v1969_v36  ;;  %v2585_v23 = vsel %vm738_vm10, %v1969_v36, %v1970_v40  ;;  %v2050_v6 = vunpack.i.h.bf16 %v2500_v47  ;;  %v2592_v16 = vsel %vm1350_vm11, %v1974_v41, %v1975_v32 }
 0x1a2   : > { %1753 = vmatpush1.bf16.msra.mxu0 %v1752_v46  ;;  %v2502_v49 = vpop.permute.xlu1 %2032  ;;  %v2588_v15 = vsel %vm1350_vm11, %v1999_v11, %v1974_v41  ;;  %v1758_v38 = vpack.c.bf16 %v496_v14, %v2541_v25  ;;  %v2030_v7 = vunpack.i.h.bf16 %v2496_v43  ;;  %v2029_v28 = vunpack.i.l.bf16 %v2496_v43 }
 0x1a3   : > { %v2504_v50 = vpop.permute.xlu0 %2052  ;;  %v1761_v4 = vpack.c.bf16 %v2580_v59, %v2538_v35  ;;  %v2605_v47 = vsel %vm1221_vm9, %v1995_v39, %v2024_v45  ;;  %v1225_v40 = vsel %vm1221_vm9, %v2024_v45, %v2025_v21  ;;  %v549_v32 = vsel %vm544_vm7, %v1919_v55, %v2049_v9 }
 0x1a4   : > { %v2055_v25 = vunpack.i.h.bf16 %v2504_v50  ;;  %v2054_v41 = vunpack.i.l.bf16 %v2504_v50  ;;  %v550_v39 = vsel %vm544_vm7, %v2049_v9, %v2050_v6  ;;  %v2622_v14 = vsel %vm738_vm10, %v2029_v28, %v2030_v7 }
 0x1a5   : > { %v2035_v55 = vunpack.i.h.bf16 %v2502_v49  ;;  %v2034_v21 = vunpack.i.l.bf16 %v2502_v49  ;;  %v1814_v9 = vpack.c.bf16 %v1225_v40, %v2558_v37  ;;  %v1817_v6 = vpack.c.bf16 %v2605_v47, %v2555_v33  ;;  %v1678_v37 = vld [vmem:[%s2879_s3 + $0x4] sm:$0xf] }
 0x1a6   : > { %v2506_v51 = vpop.permute.xlu1 %2037  ;;  %v1100_v7 = vsel %vm1094_vm2, %v2054_v41, %v2055_v25  ;;  %v2649_v33 = vsel %vm738_vm10, %v1935_v18, %v2029_v28  ;;  %v1770_v47 = vpack.c.bf16 %v2622_v14, %v2585_v23 }
 0x1a7   : > { %v2508_v52 = vpop.permute.xlu0 %2057  ;;  %v2665_v61 = vsel %vm1350_vm11, %v2000_v5, %v2034_v21  ;;  %v2668_v28 = vsel %vm1350_vm11, %v2034_v21, %v2035_v55  ;;  %v2040_v60 = vunpack.i.h.bf16 %v2506_v51 }
 0x1a8   : > { %v2059_v49 = vunpack.i.l.bf16 %v2508_v52 }
 0x1aa   : > { %v2510_v53 = vpop.permute.xlu1 %2042 }
 0x1ab   : > { %v2526_v24 = vpop.permute.xlu0 %2062 }
 0x1ac   : > { %v2065_v46 = vunpack.i.h.bf16 %v2526_v24 }
 0x1ae   : > { %v2516_v0 = vpop.permute.xlu1 %2092 }
 0x1af   : > { %v2562_v42 = vpop.permute.xlu0 %2067  ;;  %v2094_v10 = vunpack.i.l.bf16 %v2516_v0 }
 0x1b0   : > { %v2069_v21 = vunpack.i.l.bf16 %v2562_v42 }
 0x1b2   : > { %v2533_v30 = vpop.permute.xlu1 %2097 }
 0x1b3   : > { %v2613_v43 = vpop.permute.xlu0 %2072 }
 0x1b6   : > { %v2564_v44 = vpop.permute.xlu1 %2102 }
 0x1ba   : > { %v2108_v29 = vpop.permute.xlu1 %2107 }
 0x1bb   : > { %v2110_v31 = vunpack.i.h.bf16 %v2108_v29  ;;  %v2109_v36 = vunpack.i.l.bf16 %v2108_v29  ;;  %v2095_v29 = vunpack.i.h.bf16 %v2516_v0  ;;  %v2060_v0 = vunpack.i.h.bf16 %v2508_v52  ;;  %v2653_v52 = vpop.permute.xlu0 %2077 }
 0x1bd   : > { %v551_v35 = vsel %vm544_vm7, %v1920_v54, %v2109_v36  ;;  %v552_v11 = vsel %vm544_vm7, %v2109_v36, %v2110_v31  ;;  %v1099_v31 = vsel %vm1094_vm2, %v2094_v10, %v2054_v41  ;;  %v2039_v41 = vunpack.i.l.bf16 %v2506_v51 }
 0x1be   : > { %v1756_v45 = vpack.c.bf16 %v551_v35, %v549_v32  ;;  %v2113_v59 = vpop.permute.xlu1 %2112  ;;  %v1754_v50 = vpack.c.bf16 %v552_v11, %v550_v39  ;;  %v2064_v10 = vunpack.i.l.bf16 %v2526_v24  ;;  %v498_v5 = vsel %vm492_vm8, %v2059_v49, %v2060_v0 }
 0x1bf   : > { %v2115_v27 = vunpack.i.h.bf16 %v2113_v59  ;;  %v2114_v56 = vunpack.i.l.bf16 %v2113_v59  ;;  %v2099_v35 = vunpack.i.l.bf16 %v2533_v30  ;;  %v1773_v24 = vpack.c.bf16 %v2649_v33, %v2577_v48 }
 0x1c0   : > { %1755 = vmatprep.subr.bf16.mxu0 %v1754_v50  ;;  %v2704_v48 = vsel %vm865_vm12, %v1945_v57, %v2039_v41  ;;  %v1227_v51 = vsel %vm1221_vm9, %v2064_v10, %v2065_v46 }
 0x1c1   : > { %v1101_v8 = vsel %vm1094_vm2, %v2095_v29, %v2114_v56  ;;  %v1102_v36 = vsel %vm1094_vm2, %v2114_v56, %v2115_v27  ;;  %1757 = vmatpush1.bf16.msra.mxu0 %v1756_v45  ;;  %vm1467_vm2 = vcmask 908288   ;;  %v2100_v45 = vunpack.i.h.bf16 %v2533_v30  ;;  %v2708_v29 = vpop.permute.xlu0 %2082 }
 0x1c2   : > { %v1808_v40 = vpack.c.bf16 %v1102_v36, %v1100_v7  ;;  %v1811_v32 = vpack.c.bf16 %v1101_v8, %v1099_v31  ;;  %v2118_v25 = vpop.permute.xlu1 %2117  ;;  %1760 = vmatprep.subr.msk.bf16.mxu0 %vm2630_vm15, %v1758_v38  ;;  %v497_v38 = vsel %vm492_vm8, %v1929_v3, %v2059_v49  ;;  %v1711_v3 = vld [vmem:[%s2879_s3 + $0x14] sm:$0xf]  ;;  %v1826_v30 = vpack.c.bf16 %v2668_v28, %v2592_v16  ;;  %v517_v49 = vld [vmem:[%s2879_s3] sm:$0xf] }
 0x1c3   : > { %v2120_v18 = vunpack.i.h.bf16 %v2118_v25  ;;  %v2119_v23 = vunpack.i.l.bf16 %v2118_v25  ;;  %v2070_v56 = vunpack.i.h.bf16 %v2562_v42  ;;  %v2005_v16 = vunpack.i.h.bf16 %v2458_v12 }
 0x1c4   : > { %1679 = vmatmul.mubr.msk.f32.vlgmr.msra.gmra.mrb[8].mxu0 %vm561_vm1, %v1678_v37  ;;  %1810 = vmatprep.subr.msk.bf16.mxu1 %vm2474_vm5, %v1808_v40  ;;  %v869_v42 = vsel %vm865_vm12, %v2039_v41, %v2040_v60  ;;  %v2045_v36 = vunpack.i.h.bf16 %v2510_v53  ;;  %v743_v40 = vsel %vm738_vm10, %v1939_v20, %v2069_v21  ;;  %v2074_v25 = vunpack.i.l.bf16 %v2613_v43 }
 0x1c5   : > { %v499_v39 = vsel %vm492_vm8, %v1930_v1, %v2119_v23  ;;  %v500_v11 = vsel %vm492_vm8, %v2119_v23, %v2120_v18  ;;  %1763 = vmatpush1.bf16.msk.msra.mxu0 %vm2660_vm0, %v1761_v4  ;;  %1813 = vmatpush1.bf16.msk.msra.mxu1 %vm2480_vm6, %v1811_v32  ;;  %v1828_v4 = vpack.c.bf16 %v2665_v61, %v2588_v15  ;;  %v2075_v32 = vunpack.i.h.bf16 %v2613_v43  ;;  %v1721_v43 = vld [vmem:[%s2879_s3 + $0x18] sm:$0xf] }
 0x1c6   : > { %v1764_v14 = vpack.c.bf16 %v500_v11, %v498_v5  ;;  %v1767_v1 = vpack.c.bf16 %v499_v39, %v497_v38  ;;  %v2123_v55 = vpop.permute.xlu1 %2122  ;;  %1816 = vmatprep.subr.msk.bf16.mxu1 %vm2630_vm15, %v1814_v9  ;;  %703 = vmatprep.mubr.f32.mxu0 %v2236_v2  ;;  %v1226_v9 = vsel %vm1221_vm9, %v2099_v35, %v2064_v10  ;;  %v2104_v18 = vunpack.i.l.bf16 %v2564_v44  ;;  %v2088_v38 = vpop.permute.xlu0 %2087 }
 0x1c7   : > { %v2125_v59 = vunpack.i.h.bf16 %v2123_v55  ;;  %v2124_v50 = vunpack.i.l.bf16 %v2123_v55  ;;  %v1984_v28 = vunpack.i.l.bf16 %v2484_v34  ;;  %v1782_v41 = vpack.c.bf16 %v869_v42, %v2597_v58 }
 0x1c8   : > { %1766 = vmatprep.subr.msk.bf16.mxu0 %vm2630_vm15, %v1764_v14  ;;  %1720 = vmatmul.mubr.msk.f32.vlgmr.msra.gmra.mrb[0].mxu1 %vm561_vm1, %v1711_v3  ;;  %v2105_v5 = vunpack.i.h.bf16 %v2564_v44  ;;  %v1355_v11 = vsel %vm1350_vm11, %v2104_v18, %v2074_v25  ;;  %v2080_v3 = vunpack.i.h.bf16 %v2653_v52  ;;  %v1356_v58 = vsel %vm1350_vm11, %v2074_v25, %v2075_v32  ;;  %v1689_v44 = vld [vmem:[%s2879_s3 + $0x8] sm:$0xf] }
 0x1c9   : > { %v1228_v57 = vsel %vm1221_vm9, %v2100_v45, %v2124_v50  ;;  %v1229_v7 = vsel %vm1221_vm9, %v2124_v50, %v2125_v59  ;;  %1769 = vmatpush1.bf16.msk.msra.mxu0 %vm2660_vm0, %v1767_v1  ;;  %1819 = vmatpush1.bf16.msk.msra.mxu1 %vm2660_vm0, %v1817_v6  ;;  %v2044_v6 = vunpack.i.l.bf16 %v2510_v53  ;;  %v744_v53 = vsel %vm738_vm10, %v2069_v21, %v2070_v56 }
 0x1ca   : > { %v1820_v0 = vpack.c.bf16 %v1229_v7, %v1227_v51  ;;  %v1823_v31 = vpack.c.bf16 %v1228_v57, %v1226_v9  ;;  %v2128_v8 = vpop.permute.xlu1 %2127  ;;  %1772 = vmatprep.subr.msk.bf16.mxu0 %vm2474_vm5, %v1770_v47  ;;  %1315 = vmatprep.mubr.f32.mxu1 %v2236_v2  ;;  %v1985_v47 = vunpack.i.h.bf16 %v2484_v34  ;;  %v2079_v34 = vunpack.i.l.bf16 %v2653_v52  ;;  %v1731_v57 = vld [vmem:[%s2879_s3 + $0x1c] sm:$0xf] }
 0x1cb   : > { %v2130_v37 = vunpack.i.h.bf16 %v2128_v8  ;;  %v2129_v33 = vunpack.i.l.bf16 %v2128_v8  ;;  %v1471_v10 = vsel %vm1467_vm2, %v2044_v6, %v2045_v36  ;;  %v2089_v60 = vunpack.i.l.bf16 %v2088_v38 }
 0x1cc   : > { %1688 = vmatmul.mubr.msk.f32.vlgmr.msra.gmra.mrb[8].mxu0 %vm561_vm1, %v517_v49  ;;  %1822 = vmatprep.subr.msk.bf16.mxu1 %vm2630_vm15, %v1820_v0  ;;  %v2004_v1 = vunpack.i.l.bf16 %v2458_v12  ;;  %v2896_v55 = vunpack.i.l.bf16 %v2440_v63  ;;  %v1469_v61 = vsel %vm1467_vm2, %v1984_v28, %v1985_v47  ;;  %v1470_v26 = vsel %vm1467_vm2, %v2005_v16, %v2044_v6  ;;  %v1699_v6 = vld [vmem:[%s2879_s3 + $0xc] sm:$0xf] }
 0x1cd   : > { %v745_v23 = vsel %vm738_vm10, %v1940_v19, %v2129_v33  ;;  %v746_v20 = vsel %vm738_vm10, %v2129_v33, %v2130_v37  ;;  %1775 = vmatpush1.bf16.msk.msra.mxu0 %vm2480_vm6, %v1773_v24  ;;  %1825 = vmatpush1.bf16.msk.msra.mxu1 %vm2660_vm0, %v1823_v31  ;;  %v2090_v24 = vunpack.i.h.bf16 %v2088_v38  ;;  %v1834_v21 = vpack.c.bf16 %v1471_v10, %v1469_v61 }
 0x1ce   : > { %v1776_v62 = vpack.c.bf16 %v746_v20, %v744_v53  ;;  %v1779_v46 = vpack.c.bf16 %v745_v23, %v743_v40  ;;  %v2133_v19 = vpop.permute.xlu1 %2132  ;;  %1827 = vmatprep.subr.bf16.mxu1 %v1826_v30  ;;  %832 = vmatprep.mubr.f32.mxu0 %v2236_v2  ;;  %v866_v45 = vsel %vm865_vm12, %v2896_v55, %v1979_v13  ;;  %v2085_v13 = vunpack.i.h.bf16 %v2708_v29 }
 0x1cf   : > { %v2135_v35 = vunpack.i.h.bf16 %v2133_v19  ;;  %v2134_v39 = vunpack.i.l.bf16 %v2133_v19  ;;  %v871_v63 = vsel %vm865_vm12, %v2079_v34, %v2080_v3  ;;  %v2084_v30 = vunpack.i.l.bf16 %v2708_v29 }
 0x1d0   : > { %1778 = vmatprep.subr.msk.bf16.mxu0 %vm2474_vm5, %v1776_v62  ;;  %1730 = vmatmul.mubr.msk.f32.vlgmr.msra.gmra.mrb[0].mxu1 %vm561_vm1, %v1721_v43  ;;  %v870_v56 = vsel %vm865_vm12, %v2089_v60, %v2079_v34  ;;  %v1468_v7 = vsel %vm1467_vm2, %v2004_v1, %v1984_v28  ;;  %v1574_v17 = vpop.permute.xlu0 %1573 }
 0x1d1   : > { %v1357_v14 = vsel %vm1350_vm11, %v2105_v5, %v2134_v39  ;;  %1781 = vmatpush1.bf16.msk.msra.mxu0 %vm2480_vm6, %v1779_v46  ;;  %1829 = vmatpush1.bf16.msra.mxu1 %v1828_v4  ;;  %v1358_v52 = vsel %vm1350_vm11, %v2134_v39, %v2135_v35  ;;  %v1785_v4 = vpack.c.bf16 %v2704_v48, %v866_v45 }
 0x1d2   : > { %v1832_v59 = vpack.c.bf16 %v1357_v14, %v1355_v11  ;;  %v2138_v50 = vpop.permute.xlu1 %2137  ;;  %1784 = vmatprep.subr.msk.bf16.mxu0 %vm2630_vm15, %v1782_v41  ;;  %v1830_v15 = vpack.c.bf16 %v1358_v52, %v1356_v58  ;;  %1434 = vmatprep.mubr.f32.mxu1 %v2236_v2  ;;  %v1837_v29 = vpack.c.bf16 %v1470_v26, %v1468_v7 }
 0x1d3   : > { %v2140_v51 = vunpack.i.h.bf16 %v2138_v50  ;;  %v2139_v12 = vunpack.i.l.bf16 %v2138_v50  ;;  %v1473_v8 = vsel %vm1467_vm2, %v2084_v30, %v2085_v13 }
 0x1d4   : > { %1698 = vmatmul.mubr.msk.f32.vlgmr.msra.gmra.mrb[8].mxu0 %vm561_vm1, %v1689_v44  ;;  %1831 = vmatprep.subr.bf16.mxu1 %v1830_v15 }
 0x1d5   : > { %v872_v9 = vsel %vm865_vm12, %v2090_v24, %v2139_v12  ;;  %v873_v48 = vsel %vm865_vm12, %v2139_v12, %v2140_v51  ;;  %1787 = vmatpush1.bf16.msk.msra.mxu0 %vm2660_vm0, %v1785_v4  ;;  %1833 = vmatpush1.bf16.msra.mxu1 %v1832_v59 }
 0x1d6   : > { %v1788_v49 = vpack.c.bf16 %v873_v48, %v871_v63  ;;  %v1791_v16 = vpack.c.bf16 %v872_v9, %v870_v56  ;;  %v2143_v42 = vpop.permute.xlu1 %2142  ;;  %1836 = vmatprep.subr.msk.bf16.mxu1 %vm2474_vm5, %v1834_v21  ;;  %959 = vmatprep.mubr.f32.mxu0 %v2236_v2 }
 0x1d7   : > { %v2145_v0 = vunpack.i.h.bf16 %v2143_v42  ;;  %v2144_v31 = vunpack.i.l.bf16 %v2143_v42 }
 0x1d8   : > { %1790 = vmatprep.subr.msk.bf16.mxu0 %vm2630_vm15, %v1788_v49  ;;  %1732 = vmatmul.mubr.msk.f32.vlgmr.msra.gmra.mrb[0].mxu1 %vm561_vm1, %v1731_v57 }
 0x1d9   : > { %v1475_v36 = vsel %vm1467_vm2, %v2144_v31, %v2145_v0  ;;  %1793 = vmatpush1.bf16.msk.msra.mxu0 %vm2660_vm0, %v1791_v16  ;;  %1839 = vmatpush1.bf16.msk.msra.mxu1 %vm2480_vm6, %v1837_v29 }
 0x1da   : > { %v1840_v37 = vpack.c.bf16 %v1475_v36, %v1473_v8  ;;  %v2148_v33 = vpop.permute.xlu1 %2147  ;;  %1561 = vmatprep.mubr.f32.mxu1 %v2236_v2  ;;  %v1733_v2 = vld [vmem:[%s2879_s3 + $0x20] sm:$0xf] }
 0x1db   : > { %v2150_v54 = vunpack.i.h.bf16 %v2148_v33  ;;  %v2149_v40 = vunpack.i.l.bf16 %v2148_v33 }
 0x1dc   : > { %1708 = vmatmul.mubr.msk.f32.vlgmr.msra.gmra.mrb[8].mxu0 %vm561_vm1, %v1699_v6  ;;  %1842 = vmatprep.subr.msk.bf16.mxu1 %vm2474_vm5, %v1840_v37 }
 0x1dd   : > { %v1472_v27 = vsel %vm1467_vm2, %v2149_v40, %v2084_v30  ;;  %v1474_v32 = vsel %vm1467_vm2, %v2150_v54, %v2144_v31 }
 0x1de   : > { %v1843_v25 = vpack.c.bf16 %v1474_v32, %v1472_v27 }
 0x1e0   : > { %1845 = vmatpush1.bf16.msk.msra.mxu1 %vm2480_vm6, %v1843_v25 }
 0x1e3   : > { %1742 = vmatmul.mubr.msk.f32.vlgmr.msra.gmra.mrb[0].mxu1 %vm561_vm1, %v1733_v2 }
 0x2af   : > { %v961_v18 = vpop.f32.mrb[8].mxu0 }
 0x2b0   : > { %v963_v47 = vpop.f32.mrb[9].mxu0 }
 0x2b6   : > { %v1563_v53 = vpop.f32.mrb[0].mxu1 }
 0x2b7   : > { %v1846_v23 = vadd.f32 %v1563_v53, %v961_v18  ;;  %v1565_v20 = vpop.f32.mrb[1].mxu1 }
 0x2b8   : > { %v1847_v43 = vadd.f32 %v1565_v20, %v963_v47 }
 0x2b9   : > { %v1576_v28 = vadd.f32 %v1846_v23, %v1574_v17 }
 0x2ba   : > { %v1577_v41 = vadd.f32 %v1847_v43, %v1574_v17 }
 0x2bb   : > { %v1580_v38 = vmul.f32 0.70710677, %v1576_v28  ;;  %v1578_v19 = vmul.f32 0.5, %v1576_v28 }
 0x2bc   : > { %v1581_v22 = vmul.f32 0.70710677, %v1577_v41  ;;  %v1579_v5 = vmul.f32 0.5, %v1577_v41 }
 0x2bd   : > { %2168 = verf.f32 %v1580_v38 }
 0x2be   : > { %2170 = verf.f32 %v1581_v22 }
 0x2c7   : > { %v2169_v62 = vpop.eup %2168 }
 0x2c8   : > { %v2171_v46 = vpop.eup %2170  ;;  %v1584_v10 = vadd.f32 1.0, %v2169_v62 }
 0x2c9   : > { %v1585_v35 = vadd.f32 1.0, %v2171_v46 }
 0x2ca   : > { %v1586_v39 = vmul.f32 %v1584_v10, %v1578_v19 }
 0x2cb   : > { %v1587_v11 = vmul.f32 %v1585_v35, %v1579_v5 }
 0x2cd   : > { %v1590_v3 = vcombine.low %v1586_v39, %v1587_v11 }
 0x2cf   : > { %1592 = vst [vmem:[%s217_s15] sm:$0xff] %v1590_v3 }
 0x2d0   : > { %2185 = shalt.err (!%p2182_p3)
}
 0x2d1   : > { %s2186_s8 = scalar_lea.hbm %s2834_s25, 128  ;;  %s2190_s11 = scalar_lea.hbm %s2881_s5, 256 }
 0x2d2   : > { %p2187_p4 = scmp.ne.s32.totalorder %s2834_s25, %s2186_s8  ;;  %p2191_p9 = scmp.lt.u32.totalorder %s2834_s25, %s2881_s5 }
 0x2d3   : > { %p2192_p10 = scmp.lt.u32.totalorder %s2190_s11, %s2186_s8  ;;  %p2194_p12 = scmp.lt.u32.totalorder %s2186_s8, %s2834_s25 }
 0x2d4   : > { %p2188_p7 = pnand %p2187_p4, %p2315_p5 }
 0x2d5   : > { %p2193_p11 = por %p2192_p10, %p2191_p9 }
 0x2d6   : > { %p2189_p8 = pneg %p2188_p7 }
 0x2d7   : > { %p2195_p13 = por %p2194_p12, %p2193_p11 }
 0x2d9   : > { %p2196_p0 = pnand %p2195_p13, %p2189_p8 }
 0x2db   : > { %2199 = shalt.err (!%p2196_p0)
}
 0x2dc   : > { %1862 = dma.vmem_to_hbm [thread:$0]  (%p2315_p5), %s2836_s16, 128, %s2834_s25, %s1594_s26  }
 0x2dd PF: > { %p1868_p1 = scmp.ge.s32.totalorder %s2234_s21, 2  ;;  %s1620_s14 = sand.u32 1, %s2222_s18  }
 0x2de   : > { %s1621_s15 = scalar_lea.sflag [#allocation4], %s1620_s14 }
 0x2df   : > { %p1865_p2 = pnand %p1868_p1, %p2319_p6 }
 0x2e1   : > { %2217 = dma.done.wait (!%p1865_p2), %s1621_s15, 128  }
 0x2e2   : > { %2219 = vsyncadd (!%p1865_p2), %s1621_s15, 4294967168  ;;  %p15_p3 = scmp.ge.s32.totalorder %s2302_s24, 4   ;;  %s2897_s18 = smov %s2226_s19 }
 0x2e3   : > { %s2898_s19 = smov %s2230_s20  ;;  %s2899_s20 = smov %s2313_s27 }
 0x2e4   : > { %s2900_s21 = smov %s2302_s24  ;;  %17 = sbr.rel (!%p15_p3) target bundleno = 3 (0x3), region = 83 }
 0x2eb   :  { %1626 = vsyncpa [#allocation4], 1 }
 0x2ec   :  { %1628 = vsyncpa [#allocation4 + $0x1], 1 }

</bundles_post_ra>
